<compile_context>
chip_gen: v7x
topology: tpu7x:2x2x1
jax: 0.10.0
libtpu: 0.0.40
codegen_flags: <defaults>
</compile_context>

<pallas_src>
import functools

import jax
import jax.numpy as jnp
from jax.experimental import pallas as pl
from jax.experimental.pallas import tpu as pltpu


# ----------------------------------------------------------------------------
# Kernel 1: one GRU step + dot attention + context + concat Linear + tanh
# ----------------------------------------------------------------------------
def gru_attn_kernel(x_ref, h0_ref, enc_ref,
                    w_r_ref, b_r_ref, w_z_ref, b_z_ref,
                    w_in_ref, b_in_ref, w_hn_ref, b_hn_ref,
                    w_c_ref, b_c_ref,
                    hid_ref, attn_ref, cat_ref):
    x = x_ref[...]                      # (B, H)  embedded token (f32)
    h = h0_ref[...]                     # (B, H)  last_hidden[0]  (f32)
    enc = enc_ref[...]                  # (B, L, H)  encoder outputs (matmul dtype)
    wd = w_r_ref.dtype                  # MXU operand dtype (f32 or bf16)

    # ---- single GRU step (PyTorch gate order / placement of r) ----
    xh = jnp.concatenate([x, h], axis=1).astype(wd)               # (B, 2H)
    r = jax.nn.sigmoid(
        jnp.dot(xh, w_r_ref[...], preferred_element_type=jnp.float32) + b_r_ref[...])
    z = jax.nn.sigmoid(
        jnp.dot(xh, w_z_ref[...], preferred_element_type=jnp.float32) + b_z_ref[...])
    gn_i = jnp.dot(x.astype(wd), w_in_ref[...],
                   preferred_element_type=jnp.float32) + b_in_ref[...]
    gn_h = jnp.dot(h.astype(wd), w_hn_ref[...],
                   preferred_element_type=jnp.float32) + b_hn_ref[...]
    n = jnp.tanh(gn_i + r * gn_h)
    h_new = (1.0 - z) * n + z * h                                  # (B, H) f32

    # ---- dot attention on the MXU: energy[b, l] = <h_new[b], enc[b, l]> ----
    h3 = h_new[:, None, :].astype(enc.dtype)                       # (B, 1, H)
    energy = jnp.einsum('bqd,bld->bql', h3, enc,
                        preferred_element_type=jnp.float32)        # (B, 1, L)
    m = jnp.max(energy, axis=-1, keepdims=True)
    e = jnp.exp(energy - m)
    denom = jnp.sum(e, axis=-1, keepdims=True)
    attn3 = e * pl.reciprocal(denom, approx=True)                  # softmax over L, (B, 1, L)

    # ---- context[b] = sum_l attn[b, l] * enc[b, l] (MXU) ----
    ctx3 = jnp.einsum('bql,bld->bqd', attn3.astype(enc.dtype), enc,
                      preferred_element_type=jnp.float32)          # (B, 1, H)
    attn = attn3[:, 0, :]                                          # (B, L)
    context = ctx3[:, 0, :]                                        # (B, H)

    # ---- concat(rnn_output, context) -> Linear(2H, H) -> tanh ----
    cat_in = jnp.concatenate([h_new, context], axis=1).astype(wd)  # (B, 2H)
    cat_out = jnp.tanh(
        jnp.dot(cat_in, w_c_ref[...], preferred_element_type=jnp.float32) + b_c_ref[...])

    hid_ref[...] = h_new
    attn_ref[...] = attn
    cat_ref[...] = cat_out.astype(cat_ref.dtype)


# ----------------------------------------------------------------------------
# Kernel 2: vocab projection, tiled over the (lane-padded) output dimension
# ----------------------------------------------------------------------------
def vocab_proj_kernel(x_ref, w_ref, b_ref, out_ref):
    out_ref[...] = (jnp.dot(x_ref[...].astype(w_ref.dtype), w_ref[...],
                            preferred_element_type=jnp.float32)
                    + b_ref[...]).astype(out_ref.dtype)


# ----------------------------------------------------------------------------
# Wrapper: layout plumbing done once in JAX, then two pallas_calls
# ----------------------------------------------------------------------------
def luong_decoder_forward(input_seq, last_hidden, encoder_outputs, params,
                          *, matmul_dtype=jnp.float32, vocab_tile=2048):
    """Mirrors LuongAttnDecoderRNN.forward. Returns (output, hidden, attn_weights)."""
    B = input_seq.shape[0]
    L, _, H = encoder_outputs.shape
    O = params['w_out'].shape[0]
    f32 = jnp.float32
    md = matmul_dtype

    # ---- repack GRU weights per gate, pre-transposed to (in, out) ----
    w_ih = params['w_ih'].astype(f32)                    # (3H, H), rows [r; z; n]
    w_hh = params['w_hh'].astype(f32)
    b_ih = params['b_ih'].reshape(1, 3 * H).astype(f32)
    b_hh = params['b_hh'].reshape(1, 3 * H).astype(f32)
    w_ir, w_iz, w_in = w_ih[0:H], w_ih[H:2 * H], w_ih[2 * H:3 * H]
    w_hr, w_hz, w_hn = w_hh[0:H], w_hh[H:2 * H], w_hh[2 * H:3 * H]
    b_ir, b_iz, b_in = b_ih[:, 0:H], b_ih[:, H:2 * H], b_ih[:, 2 * H:3 * H]
    b_hr, b_hz, b_hn = b_hh[:, 0:H], b_hh[:, H:2 * H], b_hh[:, 2 * H:3 * H]

    w_r = jnp.concatenate([w_ir, w_hr], axis=1).T.astype(md)     # (2H, H), acts on [x, h]
    w_z = jnp.concatenate([w_iz, w_hz], axis=1).T.astype(md)     # (2H, H)
    w_in_t = w_in.T.astype(md)                                   # (H, H)
    w_hn_t = w_hn.T.astype(md)                                   # (H, H)
    b_r = b_ir + b_hr                                            # (1, H) f32
    b_z = b_iz + b_hz                                            # (1, H) f32

    w_c_t = params['w_concat'].T.astype(md)                      # (2H, H)
    b_c = params['b_concat'].reshape(1, H).astype(f32)

    # ---- vocab projection weights: pre-transposed + lane-padded to a multiple of 128 ----
    O_pad = ((O + 127) // 128) * 128
    w_out_t = jnp.pad(params['w_out'].T.astype(md), ((0, 0), (0, O_pad - O)))   # (H, O_pad)
    b_out_p = jnp.pad(params['b_out'].reshape(1, O).astype(f32),
                      ((0, 0), (0, O_pad - O)))                                 # (1, O_pad)

    # ---- activations: embedding gather (dropout = eval identity), batch-major encoder ----
    # TODO(synk): dropout is treated as eval-mode identity (no RNG mask applied).
    embedded = jnp.take(params['embedding'], input_seq, axis=0).astype(f32)     # (B, H)
    h0 = last_hidden[0].astype(f32)                                             # (B, H)
    enc_blh = jnp.transpose(encoder_outputs, (1, 0, 2)).astype(md)              # (B, L, H)

    # ---- pad batch to a multiple of 8 (sublane utilization); padded rows are discarded ----
    Bp = max(8, ((B + 7) // 8) * 8)
    if Bp != B:
        embedded = jnp.pad(embedded, ((0, Bp - B), (0, 0)))
        h0 = jnp.pad(h0, ((0, Bp - B), (0, 0)))
        enc_blh = jnp.pad(enc_blh, ((0, Bp - B), (0, 0), (0, 0)))

    vmem = pl.BlockSpec(memory_space=pltpu.MemorySpace.VMEM)
    h_new, attn, cat_out = pl.pallas_call(
        gru_attn_kernel,
        out_shape=(jax.ShapeDtypeStruct((Bp, H), f32),
                   jax.ShapeDtypeStruct((Bp, L), f32),
                   jax.ShapeDtypeStruct((Bp, H), f32)),
        in_specs=[vmem] * 13,
        out_specs=(vmem, vmem, vmem),
    )(embedded, h0, enc_blh,
      w_r, b_r, w_z, b_z, w_in_t, b_in, w_hn_t, b_hn, w_c_t, b_c)

    # ---- tiled vocab projection: "parallel" grid over the output dimension ----
    tO = min(O_pad, vocab_tile)
    grid_o = pl.cdiv(O_pad, tO)
    logits = pl.pallas_call(
        vocab_proj_kernel,
        out_shape=jax.ShapeDtypeStruct((Bp, O_pad), f32),
        grid=(grid_o,),
        in_specs=[pl.BlockSpec((Bp, H), lambda j: (0, 0)),
                  pl.BlockSpec((H, tO), lambda j: (0, j)),
                  pl.BlockSpec((1, tO), lambda j: (0, j))],
        out_specs=pl.BlockSpec((Bp, tO), lambda j: (0, j)),
        compiler_params=pltpu.CompilerParams(
            dimension_semantics=("parallel",)),
    )(cat_out, w_out_t, b_out_p)

    output = logits[:B, :O]              # (B, output_size)
    hidden = h_new[:B][None, :, :]       # (n_layers=1, B, H)
    attn_weights = attn[:B, None, :]     # (B, 1, L)
    return output, hidden, attn_weights


if __name__ == "__main__":
    B, H, L, O = 2, 32, 8, 16            # batch, hidden_size, encoder length, output_size
    key = jax.random.PRNGKey(0)
    ks = jax.random.split(key, 12)

    # Deterministic synthetic parameters (shapes from the module's __init__).
    params = dict(
        embedding=jax.random.normal(ks[0], (O, H), jnp.float32) * 0.1,
        w_ih=jax.random.normal(ks[1], (3 * H, H), jnp.float32) * 0.1,   # GRU weight_ih_l0
        w_hh=jax.random.normal(ks[2], (3 * H, H), jnp.float32) * 0.1,   # GRU weight_hh_l0
        b_ih=jax.random.normal(ks[3], (1, 3 * H), jnp.float32) * 0.1,   # GRU bias_ih_l0
        b_hh=jax.random.normal(ks[4], (1, 3 * H), jnp.float32) * 0.1,   # GRU bias_hh_l0
        w_concat=jax.random.normal(ks[5], (H, 2 * H), jnp.float32) * 0.1,
        b_concat=jax.random.normal(ks[6], (1, H), jnp.float32) * 0.1,
        w_out=jax.random.normal(ks[7], (O, H), jnp.float32) * 0.1,
        b_out=jax.random.normal(ks[8], (1, O), jnp.float32) * 0.1,
    )

    input_seq = jax.random.randint(ks[9], (B,), 0, O, dtype=jnp.int32)          # (B,)
    last_hidden = jax.random.normal(ks[10], (1, B, H), jnp.float32)             # (n_layers, B, H)
    encoder_outputs = jax.random.normal(ks[11], (L, B, H), jnp.float32)         # (L, B, H)

    fwd = functools.partial(luong_decoder_forward, matmul_dtype=jnp.float32)
    output, hidden, attn_weights = fwd(input_seq, last_hidden, encoder_outputs, params)
    jax.block_until_ready((output, hidden, attn_weights))

    assert output.shape == (B, O)
    assert hidden.shape == (1, B, H)
    assert attn_weights.shape == (B, 1, L)
    print("KERNEL_OK")
</pallas_src>

<mosaic_0001>
module attributes {stable_mosaic.version = 11 : i64} {
  func.func @gru_attn_kernel(%arg0: memref<8x32xf32, #tpu.memory_space<vmem>>, %arg1: memref<8x32xf32, #tpu.memory_space<vmem>>, %arg2: memref<8x8x32xf32, #tpu.memory_space<vmem>>, %arg3: memref<64x32xf32, #tpu.memory_space<vmem>>, %arg4: memref<1x32xf32, #tpu.memory_space<vmem>>, %arg5: memref<64x32xf32, #tpu.memory_space<vmem>>, %arg6: memref<1x32xf32, #tpu.memory_space<vmem>>, %arg7: memref<32x32xf32, #tpu.memory_space<vmem>>, %arg8: memref<1x32xf32, #tpu.memory_space<vmem>>, %arg9: memref<32x32xf32, #tpu.memory_space<vmem>>, %arg10: memref<1x32xf32, #tpu.memory_space<vmem>>, %arg11: memref<64x32xf32, #tpu.memory_space<vmem>>, %arg12: memref<1x32xf32, #tpu.memory_space<vmem>>, %arg13: memref<8x32xf32, #tpu.memory_space<vmem>>, %arg14: memref<8x8xf32, #tpu.memory_space<vmem>>, %arg15: memref<8x32xf32, #tpu.memory_space<vmem>>) attributes {dimension_semantics = [], scalar_prefetch = 0 : i64, scratch_operands = 0 : i64, tpu.core_type = #tpu.core_type<tc>} {
    %c0 = arith.constant 0 : index
    %c0_0 = arith.constant 0 : index
    %0 = vector.load %arg0[%c0, %c0_0] : memref<8x32xf32, #tpu.memory_space<vmem>>, vector<8x32xf32>
    %c0_1 = arith.constant 0 : index
    %c0_2 = arith.constant 0 : index
    %1 = vector.load %arg1[%c0_1, %c0_2] : memref<8x32xf32, #tpu.memory_space<vmem>>, vector<8x32xf32>
    %c0_3 = arith.constant 0 : index
    %c0_4 = arith.constant 0 : index
    %c0_5 = arith.constant 0 : index
    %2 = vector.load %arg2[%c0_3, %c0_4, %c0_5] : memref<8x8x32xf32, #tpu.memory_space<vmem>>, vector<8x8x32xf32>
    %3 = tpu.concatenate %0, %1 in 1 : vector<8x32xf32>, vector<8x32xf32> -> vector<8x64xf32>
    %c0_6 = arith.constant 0 : index
    %c0_7 = arith.constant 0 : index
    %4 = vector.load %arg3[%c0_6, %c0_7] : memref<64x32xf32, #tpu.memory_space<vmem>>, vector<64x32xf32>
    %cst = arith.constant dense<0.000000e+00> : vector<8x32xf32>
    %5 = tpu.matmul %3, %4, %cst {dimension_numbers = #tpu.dot_dimension_numbers<[1], [0], [0], [1], [0, 0, 1, 1], [], []>} : vector<8x64xf32>, vector<64x32xf32>, vector<8x32xf32> -> vector<8x32xf32>
    %c0_8 = arith.constant 0 : index
    %c0_9 = arith.constant 0 : index
    %6 = vector.load %arg4[%c0_8, %c0_9] : memref<1x32xf32, #tpu.memory_space<vmem>>, vector<1x32xf32>
    %7 = vector.broadcast %6 : vector<1x32xf32> to vector<8x32xf32>
    %8 = arith.addf %5, %7 : vector<8x32xf32>
    %9 = arith.negf %8 : vector<8x32xf32>
    %10 = math.exp %9 : vector<8x32xf32>
    %cst_10 = arith.constant 1.000000e+00 : f32
    %11 = vector.broadcast %cst_10 : f32 to vector<8x32xf32>
    %12 = arith.addf %11, %10 : vector<8x32xf32>
    %13 = arith.divf %11, %12 : vector<8x32xf32>
    %c0_11 = arith.constant 0 : index
    %c0_12 = arith.constant 0 : index
    %14 = vector.load %arg5[%c0_11, %c0_12] : memref<64x32xf32, #tpu.memory_space<vmem>>, vector<64x32xf32>
    %cst_13 = arith.constant dense<0.000000e+00> : vector<8x32xf32>
    %15 = tpu.matmul %3, %14, %cst_13 {dimension_numbers = #tpu.dot_dimension_numbers<[1], [0], [0], [1], [0, 0, 1, 1], [], []>} : vector<8x64xf32>, vector<64x32xf32>, vector<8x32xf32> -> vector<8x32xf32>
    %c0_14 = arith.constant 0 : index
    %c0_15 = arith.constant 0 : index
    %16 = vector.load %arg6[%c0_14, %c0_15] : memref<1x32xf32, #tpu.memory_space<vmem>>, vector<1x32xf32>
    %17 = vector.broadcast %16 : vector<1x32xf32> to vector<8x32xf32>
    %18 = arith.addf %15, %17 : vector<8x32xf32>
    %19 = arith.negf %18 : vector<8x32xf32>
    %20 = math.exp %19 : vector<8x32xf32>
    %cst_16 = arith.constant 1.000000e+00 : f32
    %21 = vector.broadcast %cst_16 : f32 to vector<8x32xf32>
    %22 = arith.addf %21, %20 : vector<8x32xf32>
    %23 = arith.divf %21, %22 : vector<8x32xf32>
    %c0_17 = arith.constant 0 : index
    %c0_18 = arith.constant 0 : index
    %24 = vector.load %arg7[%c0_17, %c0_18] : memref<32x32xf32, #tpu.memory_space<vmem>>, vector<32x32xf32>
    %cst_19 = arith.constant dense<0.000000e+00> : vector<8x32xf32>
    %25 = tpu.matmul %0, %24, %cst_19 {dimension_numbers = #tpu.dot_dimension_numbers<[1], [0], [0], [1], [0, 0, 1, 1], [], []>} : vector<8x32xf32>, vector<32x32xf32>, vector<8x32xf32> -> vector<8x32xf32>
    %c0_20 = arith.constant 0 : index
    %c0_21 = arith.constant 0 : index
    %26 = vector.load %arg8[%c0_20, %c0_21] : memref<1x32xf32, #tpu.memory_space<vmem>>, vector<1x32xf32>
    %27 = vector.broadcast %26 : vector<1x32xf32> to vector<8x32xf32>
    %28 = arith.addf %25, %27 : vector<8x32xf32>
    %c0_22 = arith.constant 0 : index
    %c0_23 = arith.constant 0 : index
    %29 = vector.load %arg9[%c0_22, %c0_23] : memref<32x32xf32, #tpu.memory_space<vmem>>, vector<32x32xf32>
    %cst_24 = arith.constant dense<0.000000e+00> : vector<8x32xf32>
    %30 = tpu.matmul %1, %29, %cst_24 {dimension_numbers = #tpu.dot_dimension_numbers<[1], [0], [0], [1], [0, 0, 1, 1], [], []>} : vector<8x32xf32>, vector<32x32xf32>, vector<8x32xf32> -> vector<8x32xf32>
    %c0_25 = arith.constant 0 : index
    %c0_26 = arith.constant 0 : index
    %31 = vector.load %arg10[%c0_25, %c0_26] : memref<1x32xf32, #tpu.memory_space<vmem>>, vector<1x32xf32>
    %32 = vector.broadcast %31 : vector<1x32xf32> to vector<8x32xf32>
    %33 = arith.addf %30, %32 : vector<8x32xf32>
    %34 = arith.mulf %13, %33 : vector<8x32xf32>
    %35 = arith.addf %28, %34 : vector<8x32xf32>
    %36 = math.tanh %35 : vector<8x32xf32>
    %cst_27 = arith.constant 1.000000e+00 : f32
    %37 = vector.broadcast %cst_27 : f32 to vector<8x32xf32>
    %38 = arith.subf %37, %23 : vector<8x32xf32>
    %39 = arith.mulf %38, %36 : vector<8x32xf32>
    %40 = arith.mulf %23, %1 : vector<8x32xf32>
    %41 = arith.addf %39, %40 : vector<8x32xf32>
    %42 = vector.shape_cast %41 : vector<8x32xf32> to vector<8x1x32xf32>
    "tpu.trace_start"() <{level = 10 : i32, message = "bqd,bld->bql"}> : () -> ()
    %cst_28 = arith.constant dense<0.000000e+00> : vector<8x1x8xf32>
    %43 = tpu.matmul %42, %2, %cst_28 {dimension_numbers = #tpu.dot_dimension_numbers<[2], [2], [1], [1], [0, 0, 0, 1, 1, 1], [0], [0]>} : vector<8x1x32xf32>, vector<8x8x32xf32>, vector<8x1x8xf32> -> vector<8x1x8xf32>
    "tpu.trace_stop"() : () -> ()
    %cst_29 = arith.constant dense<0xFF800000> : vector<8x1xf32>
    %44 = vector.multi_reduction <maximumf>, %43, %cst_29 [2] : vector<8x1x8xf32> to vector<8x1xf32>
    %45 = vector.shape_cast %44 : vector<8x1xf32> to vector<8x1x1xf32>
    %46 = vector.broadcast %45 : vector<8x1x1xf32> to vector<8x1x8xf32>
    %47 = arith.subf %43, %46 : vector<8x1x8xf32>
    %48 = math.exp %47 : vector<8x1x8xf32>
    %cst_30 = arith.constant dense<0.000000e+00> : vector<8x1xf32>
    %49 = vector.multi_reduction <add>, %48, %cst_30 [2] : vector<8x1x8xf32> to vector<8x1xf32>
    %50 = vector.shape_cast %49 : vector<8x1xf32> to vector<8x1x1xf32>
    %51 = tpu.reciprocal %50 {approx = true} : vector<8x1x1xf32> -> vector<8x1x1xf32>
    %52 = vector.broadcast %51 : vector<8x1x1xf32> to vector<8x1x8xf32>
    %53 = arith.mulf %48, %52 : vector<8x1x8xf32>
    "tpu.trace_start"() <{level = 10 : i32, message = "bql,bld->bqd"}> : () -> ()
    %cst_31 = arith.constant dense<0.000000e+00> : vector<8x1x32xf32>
    %54 = tpu.matmul %53, %2, %cst_31 {dimension_numbers = #tpu.dot_dimension_numbers<[2], [1], [1], [2], [0, 0, 0, 1, 1, 2], [0], [0]>} : vector<8x1x8xf32>, vector<8x8x32xf32>, vector<8x1x32xf32> -> vector<8x1x32xf32>
    "tpu.trace_stop"() : () -> ()
    %55 = vector.shape_cast %53 : vector<8x1x8xf32> to vector<8x8xf32>
    %56 = vector.shape_cast %54 : vector<8x1x32xf32> to vector<8x32xf32>
    %57 = tpu.concatenate %41, %56 in 1 : vector<8x32xf32>, vector<8x32xf32> -> vector<8x64xf32>
    %c0_32 = arith.constant 0 : index
    %c0_33 = arith.constant 0 : index
    %58 = vector.load %arg11[%c0_32, %c0_33] : memref<64x32xf32, #tpu.memory_space<vmem>>, vector<64x32xf32>
    %cst_34 = arith.constant dense<0.000000e+00> : vector<8x32xf32>
    %59 = tpu.matmul %57, %58, %cst_34 {dimension_numbers = #tpu.dot_dimension_numbers<[1], [0], [0], [1], [0, 0, 1, 1], [], []>} : vector<8x64xf32>, vector<64x32xf32>, vector<8x32xf32> -> vector<8x32xf32>
    %c0_35 = arith.constant 0 : index
    %c0_36 = arith.constant 0 : index
    %60 = vector.load %arg12[%c0_35, %c0_36] : memref<1x32xf32, #tpu.memory_space<vmem>>, vector<1x32xf32>
    %61 = vector.broadcast %60 : vector<1x32xf32> to vector<8x32xf32>
    %62 = arith.addf %59, %61 : vector<8x32xf32>
    %63 = math.tanh %62 : vector<8x32xf32>
    %c0_37 = arith.constant 0 : index
    %c0_38 = arith.constant 0 : index
    %64 = vector.load %arg13[%c0_37, %c0_38] : memref<8x32xf32, #tpu.memory_space<vmem>>, vector<8x32xf32>
    tpu.vector_store %arg13[%c0_37, %c0_38], %41 {strides = array<i32>} : memref<8x32xf32, #tpu.memory_space<vmem>>, vector<8x32xf32>,
    %c0_39 = arith.constant 0 : index
    %c0_40 = arith.constant 0 : index
    %65 = vector.load %arg14[%c0_39, %c0_40] : memref<8x8xf32, #tpu.memory_space<vmem>>, vector<8x8xf32>
    tpu.vector_store %arg14[%c0_39, %c0_40], %55 {strides = array<i32>} : memref<8x8xf32, #tpu.memory_space<vmem>>, vector<8x8xf32>,
    %c0_41 = arith.constant 0 : index
    %c0_42 = arith.constant 0 : index
    %66 = vector.load %arg15[%c0_41, %c0_42] : memref<8x32xf32, #tpu.memory_space<vmem>>, vector<8x32xf32>
    tpu.vector_store %arg15[%c0_41, %c0_42], %63 {strides = array<i32>} : memref<8x32xf32, #tpu.memory_space<vmem>>, vector<8x32xf32>,
    return
  }
}

</mosaic_0001>

<bundles_post_ra>
// kernel: tpu_custom_call.1
= control target key start
LH: loop header
LB: loop body
LE: loop exit
PB: predicated region body
PF: predicated region fallthrough
CT: control target
= control target key end

     0   :  { %21 = vsyncpa [#allocation3], 0  ;;  %s2364_s24 = smov 32   ;;  %v2365_v3 = vmov 0.0|0.0   ;;  %vm2366_vm0 = vmmov 0   ;;  %v2367_v12 = vmov 0.0   ;;  %s2821_s0 = inlined_call_operand.vmem [shape: f32[8,32], index: 0, kind: input, shape index: {}]   ;;  %s2822_s1 = inlined_call_operand.vmem [shape: f32[8,32], index: 1, kind: input, shape index: {}]   ;;  %s2823_s2 = inlined_call_operand.vmem [shape: f32[8,8,32], index: 2, kind: input, shape index: {}]   ;;  %s2824_s3 = inlined_call_operand.vmem [shape: f32[64,32], index: 3, kind: input, shape index: {}]   ;;  %s2825_s4 = inlined_call_operand.vmem [shape: f32[1,32], index: 4, kind: input, shape index: {}]   ;;  %s2826_s5 = inlined_call_operand.vmem [shape: f32[64,32], index: 5, kind: input, shape index: {}]   ;;  %s2827_s6 = inlined_call_operand.vmem [shape: f32[1,32], index: 6, kind: input, shape index: {}]   ;;  %s2828_s7 = inlined_call_operand.vmem [shape: f32[32,32], index: 7, kind: input, shape index: {}]   ;;  %s2829_s8 = inlined_call_operand.vmem [shape: f32[1,32], index: 8, kind: input, shape index: {}]   ;;  %s2830_s9 = inlined_call_operand.vmem [shape: f32[32,32], index: 9, kind: input, shape index: {}]   ;;  %s2831_s10 = inlined_call_operand.vmem [shape: f32[1,32], index: 10, kind: input, shape index: {}]   ;;  %s2832_s11 = inlined_call_operand.vmem [shape: f32[64,32], index: 11, kind: input, shape index: {}]   ;;  %s2833_s12 = inlined_call_operand.vmem [shape: f32[1,32], index: 12, kind: input, shape index: {}]   ;;  %s2834_s13 = inlined_call_operand.hbm [shape: f32[8,32], index: 13, kind: output, shape index: {0}]   ;;  %s2835_s14 = inlined_call_operand.hbm [shape: f32[8,8], index: 14, kind: output, shape index: {1}]   ;;  %s2836_s15 = inlined_call_operand.hbm [shape: f32[8,32], index: 15, kind: output, shape index: {2}]  }
   0x1   :  { %v2455_v0 = vld [vmem:[%s2822_s1] sm:$0xff]  ;;  %v66_v2 = vld [vmem:[%s2824_s3 + $0x8] sm:$0xff]  ;;  %2194 = vmatprep.subr.bf16.mxu0 %v2365_v3  ;;  %v67_v7 = vld [vmem:[%s2824_s3 + $0x10] sm:$0xff]  ;;  %2206 = vmatprep.subr.bf16.mxu1 %v2365_v3 }
   0x2   :  { %v65_v1 = vld [vmem:[%s2824_s3] sm:$0xff]  ;;  %60 = vrot.lane.b32.xlu0 %v2455_v0, %s2364_s24  ;;  %v161_v6 = vld [vmem:[%s2826_s5 + $0x8] sm:$0xff]  ;;  %v68_v9 = vld [vmem:[%s2824_s3 + $0x18] sm:$0xff]  ;;  %2051 = vmatprep.mubr.msk.f32.mxu0 %vm2366_vm0, %v2367_v12 }
   0x3   :  { %v2195_v4 = vpack.c.bf16 %v66_v2, %v65_v1  ;;  %v160_v5 = vld [vmem:[%s2826_s5] sm:$0xff]  ;;  %v162_v10 = vld [vmem:[%s2826_s5 + $0x10] sm:$0xff]  ;;  %v163_v11 = vld [vmem:[%s2826_s5 + $0x18] sm:$0xff]  ;;  %v2198_v13 = vpack.c.bf16 %v68_v9, %v67_v7  ;;  %2070 = vmatprep.mubr.msk.f32.mxu1 %vm2366_vm0, %v2367_v12 }
   0x4   :  { %v2207_v8 = vpack.c.bf16 %v161_v6, %v160_v5  ;;  %v2210_v14 = vpack.c.bf16 %v163_v11, %v162_v10  ;;  %v69_v15 = vld [vmem:[%s2824_s3 + $0x20] sm:$0xff]  ;;  %v70_v16 = vld [vmem:[%s2824_s3 + $0x28] sm:$0xff]  ;;  %v71_v21 = vld [vmem:[%s2824_s3 + $0x30] sm:$0xff] }
   0x5   :  { %2196 = vmatpush3.bf16.msra.mxu0 %v2195_v4  ;;  %v164_v17 = vld [vmem:[%s2826_s5 + $0x20] sm:$0xff]  ;;  %v165_v18 = vld [vmem:[%s2826_s5 + $0x28] sm:$0xff]  ;;  %v2201_v19 = vpack.c.bf16 %v70_v16, %v69_v15  ;;  %v72_v22 = vld [vmem:[%s2824_s3 + $0x38] sm:$0xff] }
   0x6   :  { %2208 = vmatpush3.bf16.msra.mxu1 %v2207_v8  ;;  %2197 = vmatprep.subr.bf16.mxu0 %v2365_v3  ;;  %v2213_v20 = vpack.c.bf16 %v165_v18, %v164_v17  ;;  %v166_v23 = vld [vmem:[%s2826_s5 + $0x30] sm:$0xff]  ;;  %v167_v24 = vld [vmem:[%s2826_s5 + $0x38] sm:$0xff] }
   0x7   :  { %2209 = vmatprep.subr.bf16.mxu1 %v2365_v3 }
   0x9   :  { %2199 = vmatpush3.bf16.msra.mxu0 %v2198_v13 }
   0xa   :  { %2211 = vmatpush3.bf16.msra.mxu1 %v2210_v14  ;;  %2200 = vmatprep.subr.bf16.mxu0 %v2365_v3 }
   0xb   :  { %2212 = vmatprep.subr.bf16.mxu1 %v2365_v3 }
   0xc   :  { %22 = vsyncpa [#allocation5], 0  ;;  %v2204_v25 = vpack.c.bf16 %v72_v22, %v71_v21  ;;  %v2216_v26 = vpack.c.bf16 %v167_v24, %v166_v23  ;;  %v251_v27 = vld [vmem:[%s2828_s7] sm:$0xff]  ;;  %v252_v28 = vld [vmem:[%s2828_s7 + $0x8] sm:$0xff]  ;;  %vm63_vm1 = vcmask 261120   ;;  %vm80_vm2 = vcmask 523264  }
   0xd   :  { %2202 = vmatpush3.bf16.msra.mxu0 %v2201_v19  ;;  %v49_v29 = vld [vmem:[%s2821_s0] sm:$0xff]  ;;  %v2219_v30 = vpack.c.bf16 %v252_v28, %v251_v27  ;;  %v253_v32 = vld [vmem:[%s2828_s7 + $0x10] sm:$0xff]  ;;  %v254_v33 = vld [vmem:[%s2828_s7 + $0x18] sm:$0xff]  ;;  %v2368_v7 = vmov 1966171168   ;;  %v430_v9 = vlaneseq  ;;  %vm1075_vm3 = vcmask 57344  }
   0xe   :  { %2214 = vmatpush3.bf16.msra.mxu1 %v2213_v20  ;;  %2203 = vmatprep.subr.bf16.mxu0 %v2365_v3  ;;  %v2222_v35 = vpack.c.bf16 %v254_v33, %v253_v32  ;;  %v335_v36 = vld [vmem:[%s2830_s9] sm:$0xff]  ;;  %v336_v37 = vld [vmem:[%s2830_s9 + $0x8] sm:$0xff]  ;;  %v337_v39 = vld [vmem:[%s2830_s9 + $0x10] sm:$0xff]  ;;  %v428_v8 = vunpack.c.l.s4 %v2368_v7  ;;  %vm1164_vm4 = vcmask 64512   ;;  %vm1758_vm5 = vcmask 1041409   ;;  %s2370_s0 = smov [#allocation2]  }
   0xf   :  { %2215 = vmatprep.subr.bf16.mxu1 %v2365_v3  ;;  %v2225_v38 = vpack.c.bf16 %v336_v37, %v335_v36  ;;  %v338_v40 = vld [vmem:[%s2830_s9 + $0x18] sm:$0xff]  ;;  %v2569_v42 = vld [vmem:[%s2823_s2] sm:$0xff]  ;;  %v2574_v43 = vld [vmem:[%s2823_s2 + $0x8] sm:$0xff]  ;;  %v431_v13 = vshrl.u32 %v430_v9, 7  ;;  %vm1761_vm6 = vcmask 1042434   ;;  %vm1764_vm7 = vcmask 1043459  }
  0x10   :  { %v2228_v41 = vpack.c.bf16 %v338_v40, %v337_v39  ;;  %v1930_v44 = vld [vmem:[%s2825_s4] ss:$0 sm:$0xff]  ;;  %v429_v11 = vunpack.c.0.s8 %v428_v8  ;;  %v2605_v23 = vld [vmem:[%s2823_s2 + $0x10] sm:$0xff]  ;;  %vm1767_vm8 = vcmask 1044484   ;;  %vm1770_vm9 = vcmask 1045509   ;;  %s1895_s30 = sshll.u32 %s2370_s0, 4  ;;  %s1896_s30 = int_to_ptr.vmem [resolvable:$true] %s1895_s30 }
  0x11   :  { %2205 = vmatpush3.bf16.msra.mxu0 %v2204_v25  ;;  %v1933_v48 = vld [vmem:[%s2827_s6] ss:$0 sm:$0xff]  ;;  %v2611_v25 = vld [vmem:[%s2823_s2 + $0x18] sm:$0xff]  ;;  %v2644_v33 = vld [vmem:[%s2823_s2 + $0x30] sm:$0xff]  ;;  %vm1773_vm10 = vcmask 1046534   ;;  %vm1776_vm11 = vcmask 1047559  }
  0x12   :  { %2217 = vmatpush3.bf16.msra.mxu1 %v2216_v26  ;;  %2095 = vmatprep.subr.mxu0 %v2367_v12  ;;  %v1938_v61 = vld [vmem:[%s2831_s10] ss:$0 sm:$0xff]  ;;  %v432_v18 = vsub.s32 %v429_v11, %v431_v13 }
  0x13   :  { %2218 = vmatprep.subr.bf16.mxu1 %v2365_v3  ;;  %v1936_v1 = vld [vmem:[%s2829_s8] ss:$0 sm:$0xff] }
  0x14   :  { %v2622_v28 = vld [vmem:[%s2823_s2 + $0x20] sm:$0xff] }
  0x74   :  { %v61_v31 = vpop.permute.xlu0 %60 }
  0x75   :  { %v64_v34 = vsel %vm63_vm1, %v49_v29, %v61_v31 }
  0x76   :  { %2052 = vmatmul.mubr.msk.f32.vlgmr.msra.gmra.mrb[0].mxu0 %vm80_vm2, %v64_v34  ;;  %2071 = vmatmul.mubr.msk.f32.vlgmr.msra.gmra.mrb[0].mxu1 %vm80_vm2, %v64_v34 }
  0x77   :  { %2220 = vmatpush3.bf16.msra.mxu1 %v2219_v30  ;;  %2081 = vmatprep.mubr.msk.f32.mxu1 %vm2366_vm0, %v2367_v12  ;;  %v2633_v30 = vld [vmem:[%s2823_s2 + $0x28] sm:$0xff] }
  0x78   :  { %2221 = vmatprep.subr.bf16.mxu1 %v2365_v3  ;;  %2097 = vmatprep.mubr.msk.f32.mxu0 %vm2366_vm0, %v2367_v12 }
  0x79   :  { %2096 = vmatpush3.xpose.msk.msra.mxu0 %vm63_vm1, %v2569_v42 }
  0x7a   :  { %2105 = vmatprep.subr.mxu0 %v2367_v12 }
  0x7b   :  { %2223 = vmatpush3.bf16.msra.mxu1 %v2222_v35  ;;  %v2655_v35 = vld [vmem:[%s2823_s2 + $0x38] sm:$0xff] }
  0x7c   :  { %2224 = vmatprep.subr.bf16.mxu1 %v2365_v3 }
  0x7e   :  { %2082 = vmatmul.mubr.msk.f32.vlgmr.msra.gmra.mrb[2].mxu1 %vm63_vm1, %v49_v29 }
  0x7f   :  { %2226 = vmatpush3.bf16.msra.mxu1 %v2225_v38  ;;  %2092 = vmatprep.mubr.msk.f32.mxu1 %vm2366_vm0, %v2367_v12 }
  0x80   :  { %2227 = vmatprep.subr.bf16.mxu1 %v2365_v3 }
  0x83   :  { %2229 = vmatpush3.bf16.msra.mxu1 %v2228_v41 }
  0x84   :  { %2100 = vmatprep.subr.mxu1 %v2367_v12 }
  0x86   :  { %2093 = vmatmul.mubr.msk.f32.vlgmr.msra.gmra.mrb[4].mxu1 %vm63_vm1, %v2455_v0 }
  0x87   :  { %2102 = vmatprep.mubr.msk.f32.mxu1 %vm2366_vm0, %v2367_v12 }
  0x8c   :  { %2101 = vmatpush3.xpose.msk.msra.mxu1 %vm63_vm1, %v2574_v43 }
  0x8d   :  { %2110 = vmatprep.subr.mxu1 %v2367_v12 }
 0x149   :  { %v150_v45 = vpop.f32.mrb[0].mxu0  ;;  %v241_v46 = vpop.f32.mrb[0].mxu1 }
 0x14a   :  { %v151_v47 = vadd.f32 %v1930_v44, %v150_v45  ;;  %v2053_v49 = vpop.f32.mrb[1].mxu0  ;;  %v2072_v50 = vpop.f32.mrb[1].mxu1  ;;  %v242_v52 = vadd.f32 %v1933_v48, %v241_v46 }
 0x14c   :  { %v1932_v51 = vmul.f32 -1.442695, %v151_v47  ;;  %v1935_v53 = vmul.f32 -1.442695, %v242_v52 }
 0x14e   :  { %2250 = vpow2.f32 %v1932_v51 }
 0x14f   :  { %2252 = vpow2.f32 %v1935_v53 }
 0x151   :  { %v331_v54 = vpop.f32.mrb[2].mxu1 }
 0x152   :  { %v2083_v55 = vpop.f32.mrb[3].mxu1  ;;  %v332_v4 = vadd.f32 %v1936_v1, %v331_v54 }
 0x158   :  { %v2251_v56 = vpop.eup %2250 }
 0x159   :  { %v157_v57 = vadd.f32 1.0, %v2251_v56  ;;  %v414_v58 = vpop.f32.mrb[4].mxu1  ;;  %v2253_v60 = vpop.eup %2252 }
 0x15a   :  { %v2094_v59 = vpop.f32.mrb[5].mxu1  ;;  %v248_v62 = vadd.f32 1.0, %v2253_v60  ;;  %v415_v63 = vadd.f32 %v1938_v61, %v414_v58 }
 0x15b   :  { %2254 = vrcp.f32 %v157_v57 }
 0x15c   :  { %2256 = vrcp.f32 %v248_v62 }
 0x165   :  { %v2255_v2 = vpop.eup %2254 }
 0x166   :  { %v418_v5 = vmul.f32 %v2255_v2, %v415_v63  ;;  %v2257_v10 = vpop.eup %2256 }
 0x167   :  { %v421_v14 = vsub.f32 1.0, %v2257_v10  ;;  %v423_v16 = vmul.f32 %v2257_v10, %v2455_v0 }
 0x168   :  { %v419_v6 = vadd.f32 %v418_v5, %v332_v4 }
 0x16a   :  { %2258 = vtanh.f32 %v419_v6 }
 0x174   :  { %v2259_v15 = vpop.eup %2258 }
 0x175   :  { %v422_v17 = vmul.f32 %v2259_v15, %v421_v14 }
 0x177   :  { %v2595_v19 = vadd.f32 %v423_v16, %v422_v17 }
 0x179   :  { %1871 = vst.msk [vmem:[#allocation2] sm:$0xff] %vm63_vm1, %v2595_v19  ;;  %v433_v20 = vrot.slane %v2595_v19, %v432_v18  ;;  %v426_v21 = vcombine.high %v2595_v19, %v2595_v19 }
 0x17b   :  { %v449_v22 = vrot.slane %v433_v20, %v432_v18  ;;  %v441_v24 = vcombine.high %v433_v20, %v433_v20  ;;  %v440_v26 = vrot.slane %v426_v21, %v432_v18 }
 0x17d   :  { %2098 = vmatmul.mubr.msk.f32.vlgmr.msra.gmra.mrb[2].mxu0 %vm63_vm1, %v449_v22  ;;  %v463_v0 = vrot.slane %v441_v24, %v432_v18  ;;  %v471_v27 = vcombine.high %v449_v22, %v449_v22  ;;  %v442_v31 = vcombine.high %v440_v26, %v440_v26  ;;  %v456_v32 = vrot.slane %v440_v26, %v432_v18 }
 0x17e   :  { %2106 = vmatpush3.xpose.msk.msra.mxu0 %vm63_vm1, %v2605_v23  ;;  %2107 = vmatprep.mubr.msk.f32.mxu0 %vm2366_vm0, %v2367_v12 }
 0x17f   :  { %2103 = vmatmul.mubr.msk.f32.vlgmr.msra.gmra.mrb[6].mxu1 %vm63_vm1, %v463_v0  ;;  %2115 = vmatprep.subr.mxu0 %v2367_v12  ;;  %v473_v29 = vcombine.high %v463_v0, %v463_v0  ;;  %v470_v34 = vrot.slane %v442_v31, %v432_v18  ;;  %v472_v36 = vcombine.high %v456_v32, %v456_v32 }
 0x180   :  { %2111 = vmatpush3.xpose.msk.msra.mxu1 %vm63_vm1, %v2611_v25  ;;  %2112 = vmatprep.mubr.msk.f32.mxu1 %vm2366_vm0, %v2367_v12 }
 0x181   :  { %2108 = vmatmul.mubr.msk.f32.vlgmr.msra.gmra.mrb[4].mxu0 %vm63_vm1, %v471_v27  ;;  %2120 = vmatprep.subr.mxu1 %v2367_v12  ;;  %v474_v37 = vcombine.high %v470_v34, %v470_v34 }
 0x182   :  { %2116 = vmatpush3.xpose.msk.msra.mxu0 %vm63_vm1, %v2622_v28  ;;  %2117 = vmatprep.mubr.msk.f32.mxu0 %vm2366_vm0, %v2367_v12 }
 0x183   :  { %2113 = vmatmul.mubr.msk.f32.vlgmr.msra.gmra.mrb[8].mxu1 %vm63_vm1, %v473_v29  ;;  %2125 = vmatprep.subr.mxu0 %v2367_v12 }
 0x184   :  { %2121 = vmatpush3.xpose.msk.msra.mxu1 %vm63_vm1, %v2633_v30  ;;  %2122 = vmatprep.mubr.msk.f32.mxu1 %vm2366_vm0, %v2367_v12 }
 0x185   :  { %2118 = vmatmul.mubr.msk.f32.vlgmr.msra.gmra.mrb[6].mxu0 %vm63_vm1, %v456_v32  ;;  %2130 = vmatprep.subr.mxu1 %v2367_v12 }
 0x186   :  { %2126 = vmatpush3.xpose.msk.msra.mxu0 %vm63_vm1, %v2644_v33  ;;  %2127 = vmatprep.mubr.msk.f32.mxu0 %vm2366_vm0, %v2367_v12 }
 0x187   :  { %2123 = vmatmul.mubr.msk.f32.vlgmr.msra.gmra.mrb[10].mxu1 %vm63_vm1, %v470_v34  ;;  %2135 = vmatprep.subr.mxu0 %v2367_v12 }
 0x188   :  { %2131 = vmatpush3.xpose.msk.msra.mxu1 %vm63_vm1, %v2655_v35  ;;  %2132 = vmatprep.mubr.msk.f32.mxu1 %vm2366_vm0, %v2367_v12 }
 0x189   :  { %2128 = vmatmul.mubr.msk.f32.vlgmr.msra.gmra.mrb[8].mxu0 %vm63_vm1, %v472_v36  ;;  %2140 = vmatprep.subr.mxu1 %v2367_v12 }
 0x18a   :  { %2136 = vmatpush3.msra.mxu0 %v2569_v42  ;;  %2137 = vmatprep.mubr.msk.f32.mxu0 %vm2366_vm0, %v2367_v12 }
 0x18b   :  { %2133 = vmatmul.mubr.msk.f32.vlgmr.msra.gmra.mrb[12].mxu1 %vm63_vm1, %v474_v37  ;;  %2145 = vmatprep.subr.mxu0 %v2367_v12 }
 0x18c   :  { %2141 = vmatpush3.msra.mxu1 %v2574_v43  ;;  %2142 = vmatprep.mubr.msk.f32.mxu1 %vm2366_vm0, %v2367_v12 }
 0x18d   :  { %2150 = vmatprep.subr.mxu1 %v2367_v12 }
 0x250   :  { %v546_v38 = vpop.f32.mrb[2].mxu0 }
 0x251   :  { %v2099_v39 = vpop.f32.mrb[3].mxu0  ;;  %v1076_v40 = vsel %vm1075_vm3, %v546_v38, -inf }
 0x252   :  { %v621_v41 = vpop.f32.mrb[6].mxu1  ;;  %1077 = vmax.xlane.f32.xlu0 %v1076_v40 }
 0x253   :  { %v2104_v42 = vpop.f32.mrb[7].mxu1  ;;  %v1079_v44 = vsel %vm1075_vm3, %v621_v41, -inf }
 0x254   :  { %1080 = vmax.xlane.f32.xlu1 %v1079_v44  ;;  %v696_v45 = vpop.f32.mrb[4].mxu0 }
 0x255   :  { %v2109_v46 = vpop.f32.mrb[5].mxu0  ;;  %v1082_v48 = vsel %vm1075_vm3, %v696_v45, -inf }
 0x256   :  { %v771_v47 = vpop.f32.mrb[8].mxu1 }
 0x257   :  { %v2114_v43 = vpop.f32.mrb[9].mxu1  ;;  %v1085_v53 = vsel %vm1075_vm3, %v771_v47, -inf }
 0x258   :  { %1083 = vmax.xlane.f32.xlu1 %v1082_v48  ;;  %v846_v49 = vpop.f32.mrb[6].mxu0 }
 0x259   :  { %v2119_v50 = vpop.f32.mrb[7].mxu0  ;;  %v1088_v58 = vsel %vm1075_vm3, %v846_v49, -inf }
 0x25a   :  { %v921_v51 = vpop.f32.mrb[10].mxu1 }
 0x25b   :  { %v2124_v52 = vpop.f32.mrb[11].mxu1  ;;  %v1091_v59 = vsel %vm1075_vm3, %v921_v51, -inf }
 0x25c   :  { %1086 = vmax.xlane.f32.xlu1 %v1085_v53  ;;  %v996_v54 = vpop.f32.mrb[8].mxu0 }
 0x25d   :  { %v2129_v55 = vpop.f32.mrb[9].mxu0  ;;  %v1094_v60 = vsel %vm1075_vm3, %v996_v54, -inf }
 0x25e   :  { %v1071_v56 = vpop.f32.mrb[12].mxu1 }
 0x25f   :  { %v2134_v57 = vpop.f32.mrb[13].mxu1  ;;  %v1097_v61 = vsel %vm1075_vm3, %v1071_v56, -inf }
 0x260   :  { %1089 = vmax.xlane.f32.xlu1 %v1088_v58 }
 0x264   :  { %1092 = vmax.xlane.f32.xlu1 %v1091_v59 }
 0x268   :  { %1095 = vmax.xlane.f32.xlu1 %v1094_v60 }
 0x26c   :  { %1098 = vmax.xlane.f32.xlu1 %v1097_v61 }
 0x2df   :  { %v1078_v62 = vpop.xlane.xlu0 %1077 }
 0x2e0   :  { %v1100_v63 = vsub.f32 %v546_v38, %v1078_v62 }
 0x2e1   :  { %v1081_v1 = vpop.xlane.xlu1 %1080 }
 0x2e2   :  { %v1108_v2 = vmul.f32 1.442695, %v1100_v63  ;;  %v1101_v4 = vsub.f32 %v621_v41, %v1081_v1 }
 0x2e4   :  { %2260 = vpow2.f32 %v1108_v2  ;;  %v1110_v5 = vmul.f32 1.442695, %v1101_v4 }
 0x2e5   :  { %v1084_v6 = vpop.xlane.xlu1 %1083 }
 0x2e6   :  { %2262 = vpow2.f32 %v1110_v5  ;;  %v1102_v7 = vsub.f32 %v696_v45, %v1084_v6 }
 0x2e8   :  { %v1112_v8 = vmul.f32 1.442695, %v1102_v7 }
 0x2e9   :  { %v1087_v9 = vpop.xlane.xlu1 %1086 }
 0x2ea   :  { %2264 = vpow2.f32 %v1112_v8  ;;  %v1103_v10 = vsub.f32 %v771_v47, %v1087_v9 }
 0x2ec   :  { %v1114_v11 = vmul.f32 1.442695, %v1103_v10 }
 0x2ed   :  { %v1090_v13 = vpop.xlane.xlu1 %1089 }
 0x2ee   :  { %v2261_v14 = vpop.eup %2260  ;;  %2266 = vpow2.f32 %v1114_v11  ;;  %v1104_v15 = vsub.f32 %v846_v49, %v1090_v13 }
 0x2ef   :  { %v1124_v16 = vsel %vm1075_vm3, %v2261_v14, 0.0 }
 0x2f0   :  { %v2263_v17 = vpop.eup %2262  ;;  %v1116_v18 = vmul.f32 1.442695, %v1104_v15  ;;  %1125 = vadd.xlane.f32.xlu1 %v1124_v16 }
 0x2f1   :  { %v1093_v20 = vpop.xlane.xlu1 %1092  ;;  %v1127_v22 = vsel %vm1075_vm3, %v2263_v17, 0.0 }
 0x2f2   :  { %2268 = vpow2.f32 %v1116_v18  ;;  %v1105_v21 = vsub.f32 %v921_v51, %v1093_v20  ;;  %v1783_v18 = vld [vmem:[%s2832_s11 + $0x8] sm:$0xff]  ;;  %v1784_v20 = vld [vmem:[%s2832_s11 + $0x10] sm:$0xff] }
 0x2f4   :  { %v2265_v24 = vpop.eup %2264  ;;  %v1118_v0 = vmul.f32 1.442695, %v1105_v21  ;;  %1128 = vadd.xlane.f32.xlu1 %v1127_v22  ;;  %v1785_v22 = vld [vmem:[%s2832_s11 + $0x18] sm:$0xff] }
 0x2f5   :  { %v1096_v26 = vpop.xlane.xlu1 %1095  ;;  %v1130_v27 = vsel %vm1075_vm3, %v2265_v24, 0.0 }
 0x2f6   :  { %2270 = vpow2.f32 %v1118_v0  ;;  %v1106_v29 = vsub.f32 %v996_v54, %v1096_v26  ;;  %1131 = vadd.xlane.f32.xlu0 %v1130_v27  ;;  %v1786_v0 = vld [vmem:[%s2832_s11 + $0x20] sm:$0xff]  ;;  %v1787_v26 = vld [vmem:[%s2832_s11 + $0x28] sm:$0xff] }
 0x2f7   :  { %v2237_v27 = vpack.c.bf16 %v1787_v26, %v1786_v0 }
 0x2f8   :  { %v2267_v31 = vpop.eup %2266  ;;  %v1120_v32 = vmul.f32 1.442695, %v1106_v29  ;;  %v1788_v29 = vld [vmem:[%s2832_s11 + $0x30] sm:$0xff] }
 0x2f9   :  { %v1099_v34 = vpop.xlane.xlu1 %1098  ;;  %v1133_v36 = vsel %vm1075_vm3, %v2267_v31, 0.0 }
 0x2fa   :  { %2272 = vpow2.f32 %v1120_v32  ;;  %v1107_v37 = vsub.f32 %v1071_v56, %v1099_v34  ;;  %1134 = vadd.xlane.f32.xlu1 %v1133_v36 }
 0x2fc   :  { %v2269_v38 = vpop.eup %2268  ;;  %v1122_v39 = vmul.f32 1.442695, %v1107_v37 }
 0x2fd   :  { %v1136_v40 = vsel %vm1075_vm3, %v2269_v38, 0.0 }
 0x2fe   :  { %2274 = vpow2.f32 %v1122_v39  ;;  %1137 = vadd.xlane.f32.xlu0 %v1136_v40 }
 0x300   :  { %v2271_v41 = vpop.eup %2270 }
 0x301   :  { %v1139_v42 = vsel %vm1075_vm3, %v2271_v41, 0.0 }
 0x302   :  { %1140 = vadd.xlane.f32.xlu1 %v1139_v42 }
 0x304   :  { %v2692_v44 = vpop.eup %2272 }
 0x305   :  { %v1142_v45 = vsel %vm1075_vm3, %v2692_v44, 0.0 }
 0x306   :  { %1143 = vadd.xlane.f32.xlu0 %v1142_v45 }
 0x308   :  { %v2696_v46 = vpop.eup %2274 }
 0x309   :  { %v1145_v47 = vsel %vm1075_vm3, %v2696_v46, 0.0 }
 0x30a   :  { %1146 = vadd.xlane.f32.xlu1 %v1145_v47 }
 0x37d   :  { %v1126_v43 = vpop.xlane.xlu1 %1125 }
 0x37e   :  { %2276 = vrcp.f32 %v1126_v43 }
 0x381   :  { %v1129_v48 = vpop.xlane.xlu1 %1128 }
 0x382   :  { %2278 = vrcp.f32 %v1129_v48 }
 0x383   :  { %v1132_v49 = vpop.xlane.xlu0 %1131 }
 0x384   :  { %2280 = vrcp.f32 %v1132_v49 }
 0x387   :  { %v1135_v50 = vpop.xlane.xlu1 %1134 }
 0x388   :  { %v2277_v51 = vpop.eup %2276  ;;  %2282 = vrcp.f32 %v1135_v50 }
 0x389   :  { %v1156_v52 = vmul.f32 %v2277_v51, %v2261_v14 }
 0x38b   :  { %v1138_v53 = vpop.xlane.xlu0 %1137  ;;  %2138 = vmatmul.mubr.msk.f32.vlgmr.msra.gmra.mrb[10].mxu0 %vm1164_vm4, %v1156_v52 }
 0x38c   :  { %v2279_v54 = vpop.eup %2278  ;;  %2284 = vrcp.f32 %v1138_v53  ;;  %2146 = vmatpush3.msra.mxu0 %v2605_v23  ;;  %2147 = vmatprep.mubr.msk.f32.mxu0 %vm2366_vm0, %v2367_v12 }
 0x38d   :  { %v1157_v55 = vmul.f32 %v2279_v54, %v2263_v17  ;;  %2155 = vmatprep.subr.mxu0 %v2367_v12 }
 0x38e   :  { %v2281_v56 = vpop.eup %2280 }
 0x38f   :  { %v1158_v57 = vmul.f32 %v2281_v56, %v2265_v24  ;;  %2143 = vmatmul.mubr.msk.f32.vlgmr.msra.gmra.mrb[14].mxu1 %vm1164_vm4, %v1157_v55  ;;  %v1141_v58 = vpop.xlane.xlu1 %1140  ;;  %v1872_v63 = vrot.slane %v1157_v55, 7  ;;  %v2234_v24 = vpack.c.bf16 %v1785_v22, %v1784_v20 }
 0x390   :  { %2286 = vrcp.f32 %v1141_v58  ;;  %2151 = vmatpush3.msra.mxu1 %v2611_v25  ;;  %2152 = vmatprep.mubr.msk.f32.mxu1 %vm2366_vm0, %v2367_v12 }
 0x391   :  { %2148 = vmatmul.mubr.msk.f32.vlgmr.msra.gmra.mrb[12].mxu0 %vm1164_vm4, %v1158_v57  ;;  %2160 = vmatprep.subr.mxu1 %v2367_v12  ;;  %v1874_v2 = vrot.slane %v1158_v57, 6  ;;  %v1873_v5 = vsel %vm1758_vm5, %v1872_v63, %v1156_v52 }
 0x392   :  { %v2283_v23 = vpop.eup %2282  ;;  %2156 = vmatpush3.msra.mxu0 %v2622_v28  ;;  %2157 = vmatprep.mubr.msk.f32.mxu0 %vm2366_vm0, %v2367_v12 }
 0x393   :  { %v1159_v59 = vmul.f32 %v2283_v23, %v2267_v31  ;;  %v1144_v60 = vpop.xlane.xlu0 %1143  ;;  %2165 = vmatprep.subr.mxu0 %v2367_v12  ;;  %v1875_v9 = vsel %vm1761_vm6, %v1874_v2, %v1873_v5  ;;  %v1789_v31 = vld [vmem:[%s2832_s11 + $0x38] sm:$0xff] }
 0x394   :  { %2288 = vrcp.f32 %v1144_v60  ;;  %v2240_v32 = vpack.c.bf16 %v1789_v31, %v1788_v29 }
 0x395   :  { %2153 = vmatmul.mubr.msk.f32.vlgmr.msra.gmra.mrb[16].mxu1 %vm1164_vm4, %v1159_v59  ;;  %v1876_v4 = vrot.slane %v1159_v59, 5 }
 0x396   :  { %v2285_v25 = vpop.eup %2284  ;;  %2161 = vmatpush3.msra.mxu1 %v2633_v30  ;;  %2162 = vmatprep.mubr.msk.f32.mxu1 %vm2366_vm0, %v2367_v12 }
 0x397   :  { %v1160_v61 = vmul.f32 %v2285_v25, %v2269_v38  ;;  %v1147_v62 = vpop.xlane.xlu1 %1146  ;;  %2170 = vmatprep.subr.mxu1 %v2367_v12  ;;  %v1877_v11 = vsel %vm1764_vm7, %v1876_v4, %v1875_v9 }
 0x398   :  { %2290 = vrcp.f32 %v1147_v62 }
 0x399   :  { %2158 = vmatmul.mubr.msk.f32.vlgmr.msra.gmra.mrb[14].mxu0 %vm1164_vm4, %v1160_v61  ;;  %v1878_v6 = vrot.slane %v1160_v61, 4 }
 0x39a   :  { %v2287_v28 = vpop.eup %2286  ;;  %2166 = vmatpush3.msra.mxu0 %v2644_v33  ;;  %2167 = vmatprep.mubr.msk.f32.mxu0 %vm2366_vm0, %v2367_v12 }
 0x39b   :  { %v1161_v1 = vmul.f32 %v2287_v28, %v2271_v41  ;;  %2230 = vmatprep.subr.bf16.mxu0 %v2365_v3  ;;  %v1879_v13 = vsel %vm1767_vm8, %v1878_v6, %v1877_v11 }
 0x39d   :  { %2163 = vmatmul.mubr.msk.f32.vlgmr.msra.gmra.mrb[18].mxu1 %vm1164_vm4, %v1161_v1  ;;  %v1880_v7 = vrot.slane %v1161_v1, 3 }
 0x39e   :  { %v2289_v30 = vpop.eup %2288  ;;  %2171 = vmatpush3.msra.mxu1 %v2655_v35  ;;  %2172 = vmatprep.mubr.msk.f32.mxu1 %vm2366_vm0, %v2367_v12 }
 0x39f   :  { %v1162_v33 = vmul.f32 %v2289_v30, %v2692_v44  ;;  %v1881_v14 = vsel %vm1770_vm9, %v1880_v7, %v1879_v13 }
 0x3a1   :  { %2168 = vmatmul.mubr.msk.f32.vlgmr.msra.gmra.mrb[16].mxu0 %vm1164_vm4, %v1162_v33  ;;  %v1882_v35 = vrot.slane %v1162_v33, 2 }
 0x3a2   :  { %v2291_v8 = vpop.eup %2290  ;;  %2191 = vmatprep.mubr.msk.f32.mxu0 %vm2366_vm0, %v2367_v12  ;;  %v1782_v12 = vld [vmem:[%s2832_s11] sm:$0xff]  ;;  %s2369_s11 = smov [#allocation4]  }
 0x3a3   :  { %v1163_v10 = vmul.f32 %v2291_v8, %v2696_v46  ;;  %v1883_v16 = vsel %vm1773_vm10, %v1882_v35, %v1881_v14  ;;  %v2231_v21 = vpack.c.bf16 %v1783_v18, %v1782_v12  ;;  %s1905_s29 = sshll.u32 %s2369_s11, 4  ;;  %s1906_s29 = int_to_ptr.vmem [resolvable:$true] %s1905_s29 }
 0x3a4   :  { %s2294_s16 = scalar_lea.vmem %s1906_s29, 128  ;;  %p2299_p1 = scmp.lt.s32.totalorder %s1906_s29, %s1906_s29 }
 0x3a5   :  { %2173 = vmatmul.mubr.msk.f32.vlgmr.msra.gmra.mrb[20].mxu1 %vm1164_vm4, %v1163_v10  ;;  %v1884_v15 = vrot.slane %v1163_v10, 1  ;;  %2232 = vmatpush3.bf16.msra.mxu0 %v2231_v21  ;;  %p2295_p0 = scmp.ne.s32.totalorder %s1906_s29, %s2294_s16  ;;  %p2300_p2 = scmp.lt.s32.totalorder %s2294_s16, %s2294_s16 }
 0x3a6   :  { %2233 = vmatprep.subr.bf16.mxu0 %v2365_v3 }
 0x3a7   :  { %v1885_v17 = vsel %vm1776_vm11, %v1884_v15, %v1883_v16  ;;  %p2301_p3 = por %p2300_p2, %p2299_p1 }
 0x3a8   :  { %1887 = vst.msk [vmem:[#allocation4] sm:$0xff] %vm1164_vm4, %v1885_v17 }
 0x3a9   :  { %2235 = vmatpush3.bf16.msra.mxu0 %v2234_v24  ;;  %p2302_p4 = pnand %p2301_p3, %p2295_p0 }
 0x3aa   :  { %2236 = vmatprep.subr.bf16.mxu0 %v2365_v3 }
 0x3ad   :  { %2238 = vmatpush3.bf16.msra.mxu0 %v2237_v27 }
 0x3ae   :  { %2239 = vmatprep.subr.bf16.mxu0 %v2365_v3 }
 0x3b1   :  { %2241 = vmatpush3.bf16.msra.mxu0 %v2240_v32 }
 0x45e   :  { %v1234_v34 = vpop.f32.mrb[10].mxu0 }
 0x45f   :  { %v2139_v36 = vpop.f32.mrb[11].mxu0 }
 0x462   :  { %v1307_v37 = vpop.f32.mrb[14].mxu1 }
 0x463   :  { %v1757_v38 = vrot.slane %v1307_v37, 7  ;;  %v2144_v39 = vpop.f32.mrb[15].mxu1 }
 0x464   :  { %v1380_v40 = vpop.f32.mrb[12].mxu0 }
 0x465   :  { %v1759_v41 = vsel %vm1758_vm5, %v1757_v38, %v1234_v34  ;;  %v1760_v42 = vrot.slane %v1380_v40, 6  ;;  %v2149_v44 = vpop.f32.mrb[13].mxu0 }
 0x467   :  { %v1762_v45 = vsel %vm1761_vm6, %v1760_v42, %v1759_v41 }
 0x468   :  { %v1453_v46 = vpop.f32.mrb[16].mxu1 }
 0x469   :  { %v1763_v47 = vrot.slane %v1453_v46, 5  ;;  %v2154_v43 = vpop.f32.mrb[17].mxu1 }
 0x46b   :  { %v1765_v48 = vsel %vm1764_vm7, %v1763_v47, %v1762_v45 }
 0x46c   :  { %v1526_v49 = vpop.f32.mrb[14].mxu0 }
 0x46d   :  { %v1766_v3 = vrot.slane %v1526_v49, 4  ;;  %v2159_v50 = vpop.f32.mrb[15].mxu0 }
 0x46f   :  { %v1768_v51 = vsel %vm1767_vm8, %v1766_v3, %v1765_v48 }
 0x470   :  { %v1599_v52 = vpop.f32.mrb[18].mxu1 }
 0x471   :  { %v1769_v53 = vrot.slane %v1599_v52, 3  ;;  %v2164_v54 = vpop.f32.mrb[19].mxu1 }
 0x473   :  { %v1771_v55 = vsel %vm1770_vm9, %v1769_v53, %v1768_v51 }
 0x474   :  { %v1672_v56 = vpop.f32.mrb[16].mxu0 }
 0x475   :  { %v1772_v57 = vrot.slane %v1672_v56, 2  ;;  %v2169_v58 = vpop.f32.mrb[17].mxu0 }
 0x477   :  { %v1774_v23 = vsel %vm1773_vm10, %v1772_v57, %v1771_v55 }
 0x478   :  { %v1745_v59 = vpop.f32.mrb[20].mxu1 }
 0x479   :  { %v1775_v60 = vrot.slane %v1745_v59, 1  ;;  %v2174_v25 = vpop.f32.mrb[21].mxu1 }
 0x47b   :  { %v1777_v61 = vsel %vm1776_vm11, %v1775_v60, %v1774_v23 }
 0x47c   :  { %1778 = vrot.lane.b32.xlu0 %v1777_v61, %s2364_s24 }
 0x4ee   :  { %v1779_v62 = vpop.permute.xlu0 %1778 }
 0x4ef   :  { %v1781_v28 = vsel %vm63_vm1, %v2595_v19, %v1779_v62 }
 0x4f0   :  { %2192 = vmatmul.mubr.msk.f32.vlgmr.msra.gmra.mrb[18].mxu0 %vm80_vm2, %v1781_v28 }
 0x4f1   :  { %2305 = shalt.err (!%p2302_p4)
}
 0x4f2   :  { %s2306_s7 = scalar_lea.hbm %s2835_s14, 128 }
 0x4f3   :  { %p2307_p5 = scmp.ne.s32.totalorder %s2835_s14, %s2306_s7  ;;  %p2310_p6 = scmp.lt.u32.totalorder %s2306_s7, %s2835_s14 }
 0x4f5   :  { %p2312_p7 = pnand %p2310_p6, %p2307_p5 }
 0x4f7   :  { %2315 = shalt.err (!%p2312_p7)
}
 0x4f8   :  { %1908 = dma.vmem_to_hbm [thread:$0]  %s1906_s29, 128, %s2835_s14, [#allocation5]  }
 0x4f9   :  { %s2316_s3 = scalar_lea.vmem %s1896_s30, 128  ;;  %p2321_p9 = scmp.lt.s32.totalorder %s1896_s30, %s1896_s30 }
 0x4fa   :  { %p2317_p8 = scmp.ne.s32.totalorder %s1896_s30, %s2316_s3  ;;  %p2322_p10 = scmp.lt.s32.totalorder %s2316_s3, %s2316_s3 }
 0x4fc   :  { %p2323_p11 = por %p2322_p10, %p2321_p9 }
 0x4fe   :  { %p2324_p12 = pnand %p2323_p11, %p2317_p8 }
 0x500   :  { %2327 = shalt.err (!%p2324_p12)
}
 0x501   :  { %s2328_s23 = scalar_lea.hbm %s2834_s13, 128 }
 0x502   :  { %p2329_p13 = scmp.ne.s32.totalorder %s2834_s13, %s2328_s23  ;;  %p2332_p0 = scmp.lt.u32.totalorder %s2328_s23, %s2834_s13 }
 0x504   :  { %p2334_p1 = pnand %p2332_p0, %p2329_p13 }
 0x506   :  { %2337 = shalt.err (!%p2334_p1)
}
 0x507   :  { %1898 = dma.vmem_to_hbm [thread:$0]  %s1896_s30, 128, %s2834_s13, [#allocation3]   ;;  %v1964_v19 = vld [vmem:[%s2833_s12] ss:$0 sm:$0xff] }
 0x508   :  { %s2371_s10 = smov [#allocation6]  }
 0x509   :  { %s1915_s28 = sshll.u32 %s2371_s10, 4  ;;  %s1916_s28 = int_to_ptr.vmem [resolvable:$true] %s1915_s28 }
 0x50a   :  { %s2338_s11 = scalar_lea.vmem %s1916_s28, 128  ;;  %p2343_p3 = scmp.lt.s32.totalorder %s1916_s28, %s1916_s28 }
 0x50b   :  { %p2339_p2 = scmp.ne.s32.totalorder %s1916_s28, %s2338_s11  ;;  %p2344_p4 = scmp.lt.s32.totalorder %s2338_s11, %s2338_s11 }
 0x50d   :  { %p2345_p5 = por %p2344_p4, %p2343_p3 }
 0x50f   :  { %p2346_p6 = pnand %p2345_p5, %p2339_p2 }
 0x5c3   :  { %v1866_v63 = vpop.f32.mrb[18].mxu0 }
 0x5c4   :  { %v1867_v1 = vadd.f32 %v1964_v19, %v1866_v63  ;;  %v2193_v30 = vpop.f32.mrb[19].mxu0 }
 0x5c6   :  { %2292 = vtanh.f32 %v1867_v1 }
 0x5d0   :  { %v2293_v2 = vpop.eup %2292 }
 0x5d1   :  { %1888 = vst.msk [vmem:[#allocation6] sm:$0xff] %vm63_vm1, %v2293_v2 }
 0x5d2   :  { %2349 = shalt.err (!%p2346_p6)
}
 0x5d3   :  { %s2350_s12 = scalar_lea.hbm %s2836_s15, 128 }
 0x5d4   :  { %p2351_p7 = scmp.ne.s32.totalorder %s2836_s15, %s2350_s12  ;;  %p2354_p8 = scmp.lt.u32.totalorder %s2350_s12, %s2836_s15 }
 0x5d6   :  { %p2356_p9 = pnand %p2354_p8, %p2351_p7 }
 0x5d8   :  { %2359 = shalt.err (!%p2356_p9)
}
 0x5d9   :  { %1918 = dma.vmem_to_hbm [thread:$0]  %s1916_s28, 128, %s2836_s15, [#allocation5]  }
 0x5da   :  { %2360 = dma.done.wait [#allocation3], 128  }
 0x5db   :  { %2361 = vsyncadd [#allocation3], 4294967168 }
 0x5dc   :  { %2362 = dma.done.wait [#allocation5], 256  }
 0x5dd   :  { %2363 = vsyncadd [#allocation5], 4294967040 }
 0x5de   :  { %1928 = vsyncpa [#allocation3], 1 }
 0x5df   :  { %1929 = vsyncpa [#allocation5], 1 }

</bundles_post_ra>
